<compile_context>
chip_gen: v7x
topology: tpu7x:2x2x1
jax: 0.10.0
libtpu: 0.0.40
codegen_flags: <defaults>
</compile_context>

<pallas_src>
import functools

import jax
import jax.numpy as jnp
from jax.experimental import pallas as pl
from jax.experimental.pallas import tpu as pltpu


def _round_up(x, m):
    return ((x + m - 1) // m) * m


def _cdiv(a, b):
    return -(-a // b)


def _even_split(dim, tile_max, granule):
    """Pick (tile, padded_dim, n_blocks) so padding waste <= one granule/block."""
    aligned = _round_up(dim, granule)
    tile_max = _round_up(tile_max, granule)
    if aligned <= tile_max:
        return aligned, aligned, 1
    n = _cdiv(aligned, tile_max)
    tile = _round_up(_cdiv(aligned, n), granule)
    return tile, n * tile, n


def _pad2(a, rows, cols):
    pr, pc = rows - a.shape[0], cols - a.shape[1]
    if pr == 0 and pc == 0:
        return a  # skip the copy when already aligned
    return jnp.pad(a, ((0, pr), (0, pc)))


def _fc_kernel(x_ref, w_ref, b_ref, o_ref, acc_ref, *, act_fn):
    # x_ref: (tm, tk)  activation block (f32 or bf16)
    # w_ref: (tk, tn)  weight block, already transposed to (In, Out) layout
    # b_ref: (1,  tn)  bias block (f32)
    # o_ref: (tm, tn)  output block (resident across the K axis)
    # acc_ref: (tm, tn) f32 accumulator scratch
    k = pl.program_id(2)

    prod = jnp.dot(x_ref[...], w_ref[...], preferred_element_type=jnp.float32)

    @pl.when(k == 0)
    def _():
        # First K step: write directly (saves a zero-init store + full-tile
        # read-modify-write per output tile).
        acc_ref[...] = prod

    @pl.when(k > 0)
    def _():
        acc_ref[...] += prod

    @pl.when(k == pl.num_programs(2) - 1)
    def _():
        y = acc_ref[...] + b_ref[...]
        if act_fn == "relu":
            y = jnp.maximum(y, 0.0)
        elif act_fn == "lrelu":
            # torch.nn.LeakyReLU default negative_slope = 0.01
            y = jnp.where(y >= 0.0, y, 0.01 * y)
        elif act_fn == "sigmoid":
            # Exact sigmoid: exp lands on the EUP slot (idle in the epilogue),
            # so exactness costs essentially nothing vs. the approx reciprocal.
            y = 1.0 / (1.0 + jnp.exp(-y))
        # 'linear' -> identity
        o_ref[...] = y.astype(o_ref.dtype)


class PallasFullyConnected:
    """Pallas-TPU port of the PyTorch FullyConnected module.

    Weight is transposed to (In, Out), cast (optionally to bf16) and padded
    once at construction, so the per-call cost is just the tiled matmul kernel
    (plus an activation pad only when the batch / feature dims are unaligned).
    """

    def __init__(self, weight, bias, activation_fn="linear", *,
                 mxu_bf16=False, tm_max=512, tn_max=512, tk_max=1024):
        Out, In = weight.shape
        assert bias.shape == (Out,), "bias must be (Out,)"
        self.act_fn = activation_fn
        self.mxu_bf16 = bool(mxu_bf16)
        self.In, self.Out = In, Out
        # Sublane granule for the M (batch) tile: bf16 operands pack 2 rows
        # per 32-bit sublane -> 16-row granule; f32 -> 8.
        self.sub = 16 if self.mxu_bf16 else 8
        self.tm_max = _round_up(tm_max, self.sub)

        # K (In) and N (Out) tiles via even-split (waste <= one 128 granule).
        self.tk, self.Inp, self.nk = _even_split(In, tk_max, 128)
        self.tn, self.Outp, self.nj = _even_split(Out, tn_max, 128)
        # v7x megacore: keep >=2 independent (i, j) output blocks when Out
        # allows it, so (parallel, parallel) can shard across both TensorCores
        # even for single-M-block (small batch) calls.
        if self.nj == 1 and self.Outp >= 256:
            self.tn = _round_up(_cdiv(self.Outp, 2), 128)
            self.nj = _cdiv(self.Outp, self.tn)
            self.Outp = self.nj * self.tn

        stream_dtype = jnp.bfloat16 if self.mxu_bf16 else jnp.dtype(weight.dtype)
        # Pre-transpose once to (In, Out): canonical (M,K)x(K,N) MXU feed, no
        # per-K-step XLU transpose of the weight tile inside the kernel.
        w_t = jnp.asarray(weight, stream_dtype).T
        self.w_p = _pad2(w_t, self.Inp, self.Outp)
        self.b_p = _pad2(jnp.asarray(bias, jnp.float32).reshape(1, Out), 1, self.Outp)

    def __call__(self, x):
        B, In = x.shape
        assert In == self.In, "x must be (B, In)"
        out_dtype = x.dtype

        tm, Bp, ni = _even_split(B, self.tm_max, self.sub)
        x_in = jnp.asarray(x, jnp.bfloat16) if self.mxu_bf16 else x
        x_p = _pad2(x_in, Bp, self.Inp)

        # Advisory cost: account for the actual HBM re-reads (x is streamed
        # once per N block, w once per M block).
        bytes_x = Bp * self.Inp * x_p.dtype.itemsize
        bytes_w = self.Inp * self.Outp * self.w_p.dtype.itemsize
        bytes_o = Bp * self.Outp * jnp.dtype(out_dtype).itemsize
        cost = pl.CostEstimate(
            flops=2 * Bp * self.Inp * self.Outp,
            transcendentals=(Bp * self.Outp if self.act_fn == "sigmoid" else 0),
            bytes_accessed=bytes_x * self.nj + bytes_w * ni
                           + self.Outp * 4 + bytes_o,
        )

        kernel = functools.partial(_fc_kernel, act_fn=self.act_fn)
        tk, tn = self.tk, self.tn

        out_p = pl.pallas_call(
            kernel,
            out_shape=jax.ShapeDtypeStruct((Bp, self.Outp), out_dtype),
            grid_spec=pltpu.PrefetchScalarGridSpec(
                num_scalar_prefetch=0,
                grid=(ni, self.nj, self.nk),
                in_specs=[
                    pl.BlockSpec((tm, tk), lambda i, j, k: (i, k)),  # x tile
                    pl.BlockSpec((tk, tn), lambda i, j, k: (k, j)),  # w (In,Out) tile
                    pl.BlockSpec((1, tn), lambda i, j, k: (0, j)),   # bias tile
                ],
                out_specs=pl.BlockSpec((tm, tn), lambda i, j, k: (i, j)),
                scratch_shapes=[pltpu.VMEM((tm, tn), jnp.float32)],
            ),
            compiler_params=pltpu.CompilerParams(
                dimension_semantics=("parallel", "parallel", "arbitrary"),
            ),
            cost_estimate=cost,
        )(x_p, self.w_p, self.b_p)

        if Bp == B and self.Outp == self.Out:
            return out_p
        return out_p[:B, :self.Out]


def fully_connected(x, weight, bias, act_fn="linear", *, mxu_bf16=False):
    """Functional convenience wrapper: y = act(x @ weight.T + bias).

    x: (B, In); weight: (Out, In) (PyTorch nn.Linear layout); bias: (Out,).
    For repeated calls with the same parameters, build PallasFullyConnected
    once instead (weight transpose/pad is then amortized to zero).
    """
    return PallasFullyConnected(weight, bias, act_fn, mxu_bf16=mxu_bf16)(x)


def _reference(x, weight, bias, act_fn):
    y = x @ weight.T + bias
    if act_fn == "relu":
        y = jnp.maximum(y, 0.0)
    elif act_fn == "lrelu":
        y = jnp.where(y >= 0.0, y, 0.01 * y)
    elif act_fn == "sigmoid":
        y = jax.nn.sigmoid(y)
    return y


if __name__ == "__main__":
    key = jax.random.PRNGKey(0)
    k_x, k_w, k_b = jax.random.split(key, 3)

    batch, input_size, output_size = 8, 32, 16

    x = jax.random.normal(k_x, (batch, input_size), dtype=jnp.float32)
    # Deterministic "Kaiming-uniform-ish" init consistent with nn.Linear shapes.
    bound = 1.0 / jnp.sqrt(input_size)
    weight = jax.random.uniform(
        k_w, (output_size, input_size), minval=-bound, maxval=bound,
        dtype=jnp.float32)
    bias = jax.random.uniform(
        k_b, (output_size,), minval=-bound, maxval=bound, dtype=jnp.float32)

    ok = True

    # Exact (f32) path: matches the PyTorch f32 module tightly for all
    # activations, including sigmoid (now exact in the epilogue).
    for act in ("linear", "relu", "lrelu", "sigmoid"):
        module = PallasFullyConnected(weight, bias, activation_fn=act)
        out = jax.block_until_ready(module(x))
        ref = _reference(x, weight, bias, act)
        if not jnp.allclose(out, ref, atol=1e-5, rtol=1e-5):
            ok = False
            print(f"MISMATCH for activation={act} (f32 path)")

    # bf16-fed MXU fast path (f32 accumulation): looser tolerance by design.
    module_bf16 = PallasFullyConnected(weight, bias, activation_fn="relu",
                                       mxu_bf16=True)
    out_bf16 = jax.block_until_ready(module_bf16(x))
    ref_bf16 = _reference(x, weight, bias, "relu")
    if not jnp.allclose(out_bf16, ref_bf16, atol=3e-2, rtol=3e-2):
        ok = False
        print("MISMATCH for activation=relu (bf16 MXU path)")

    if ok:
        print("KERNEL_OK")
</pallas_src>

<mosaic_0001>
module attributes {stable_mosaic.version = 11 : i64} {
  func.func @_fc_kernel(%arg0: i32, %arg1: i32, %arg2: i32, %arg3: memref<8x128xf32, #tpu.memory_space<vmem>>, %arg4: memref<128x128xf32, #tpu.memory_space<vmem>>, %arg5: memref<1x128xf32, #tpu.memory_space<vmem>>, %arg6: memref<8x128xf32, #tpu.memory_space<vmem>>, %arg7: memref<8x128xf32, #tpu.memory_space<vmem>>) attributes {dimension_semantics = [#tpu.dimension_semantics<parallel>, #tpu.dimension_semantics<parallel>, #tpu.dimension_semantics<arbitrary>], iteration_bounds = array<i64: 1, 1, 1>, scalar_prefetch = 0 : i64, scratch_operands = 1 : i64, tpu.core_type = #tpu.core_type<tc>, window_params = [{transform_indices = @transform_0, window_bounds = array<i64: 8, 128>}, {transform_indices = @transform_1, window_bounds = array<i64: 128, 128>}, {transform_indices = @transform_2, window_bounds = array<i64: 1, 128>}, {transform_indices = @transform_3, window_bounds = array<i64: 8, 128>}]} {
    %c0 = arith.constant 0 : index
    %c0_0 = arith.constant 0 : index
    %0 = vector.load %arg3[%c0, %c0_0] : memref<8x128xf32, #tpu.memory_space<vmem>>, vector<8x128xf32>
    %c0_1 = arith.constant 0 : index
    %c0_2 = arith.constant 0 : index
    %1 = vector.load %arg4[%c0_1, %c0_2] : memref<128x128xf32, #tpu.memory_space<vmem>>, vector<128x128xf32>
    %cst = arith.constant dense<0.000000e+00> : vector<8x128xf32>
    %2 = tpu.matmul %0, %1, %cst {dimension_numbers = #tpu.dot_dimension_numbers<[1], [0], [0], [1], [0, 0, 1, 1], [], []>} : vector<8x128xf32>, vector<128x128xf32>, vector<8x128xf32> -> vector<8x128xf32>
    %c0_i32 = arith.constant 0 : i32
    %3 = arith.cmpi eq, %arg2, %c0_i32 : i32
    %4 = arith.extui %3 : i1 to i32
    %c0_i32_3 = arith.constant 0 : i32
    %5 = arith.cmpi ne, %4, %c0_i32_3 : i32
    scf.if %5 {
      %c0_8 = arith.constant 0 : index
      %c0_9 = arith.constant 0 : index
      %12 = vector.load %arg7[%c0_8, %c0_9] : memref<8x128xf32, #tpu.memory_space<vmem>>, vector<8x128xf32>
      tpu.vector_store %arg7[%c0_8, %c0_9], %2 {strides = array<i32>} : memref<8x128xf32, #tpu.memory_space<vmem>>, vector<8x128xf32>,
    } else {
    }
    %c0_i32_4 = arith.constant 0 : i32
    %6 = arith.cmpi sgt, %arg2, %c0_i32_4 : i32
    %7 = arith.extui %6 : i1 to i32
    %c0_i32_5 = arith.constant 0 : i32
    %8 = arith.cmpi ne, %7, %c0_i32_5 : i32
    scf.if %8 {
      %c0_8 = arith.constant 0 : index
      %c0_9 = arith.constant 0 : index
      %12 = vector.load %arg7[%c0_8, %c0_9] : memref<8x128xf32, #tpu.memory_space<vmem>>, vector<8x128xf32>
      %13 = arith.addf %12, %2 : vector<8x128xf32>
      %c0_10 = arith.constant 0 : index
      %c0_11 = arith.constant 0 : index
      %14 = vector.load %arg7[%c0_10, %c0_11] : memref<8x128xf32, #tpu.memory_space<vmem>>, vector<8x128xf32>
      tpu.vector_store %arg7[%c0_10, %c0_11], %13 {strides = array<i32>} : memref<8x128xf32, #tpu.memory_space<vmem>>, vector<8x128xf32>,
    } else {
    }
    %c0_i32_6 = arith.constant 0 : i32
    %9 = arith.cmpi eq, %arg2, %c0_i32_6 : i32
    %10 = arith.extui %9 : i1 to i32
    %c0_i32_7 = arith.constant 0 : i32
    %11 = arith.cmpi ne, %10, %c0_i32_7 : i32
    scf.if %11 {
      %c0_8 = arith.constant 0 : index
      %c0_9 = arith.constant 0 : index
      %12 = vector.load %arg7[%c0_8, %c0_9] : memref<8x128xf32, #tpu.memory_space<vmem>>, vector<8x128xf32>
      %c0_10 = arith.constant 0 : index
      %c0_11 = arith.constant 0 : index
      %13 = vector.load %arg5[%c0_10, %c0_11] : memref<1x128xf32, #tpu.memory_space<vmem>>, vector<1x128xf32>
      %14 = vector.broadcast %13 : vector<1x128xf32> to vector<8x128xf32>
      %15 = arith.addf %12, %14 : vector<8x128xf32>
      %c0_12 = arith.constant 0 : index
      %c0_13 = arith.constant 0 : index
      %16 = vector.load %arg6[%c0_12, %c0_13] : memref<8x128xf32, #tpu.memory_space<vmem>>, vector<8x128xf32>
      tpu.vector_store %arg6[%c0_12, %c0_13], %15 {strides = array<i32>} : memref<8x128xf32, #tpu.memory_space<vmem>>, vector<8x128xf32>,
    } else {
    }
    return
  }
  func.func @transform_0(%arg0: i32, %arg1: i32, %arg2: i32) -> (i32, i32) {
    %c0_i32 = arith.constant 0 : i32
    return %arg0, %arg2 : i32, i32
  }
  func.func @transform_1(%arg0: i32, %arg1: i32, %arg2: i32) -> (i32, i32) {
    %c0_i32 = arith.constant 0 : i32
    return %arg2, %arg1 : i32, i32
  }
  func.func @transform_2(%arg0: i32, %arg1: i32, %arg2: i32) -> (i32, i32) {
    %c0_i32 = arith.constant 0 : i32
    %c0_i32_0 = arith.constant 0 : i32
    return %c0_i32, %arg1 : i32, i32
  }
  func.func @transform_3(%arg0: i32, %arg1: i32, %arg2: i32) -> (i32, i32) {
    %c0_i32 = arith.constant 0 : i32
    return %arg0, %arg1 : i32, i32
  }
}

</mosaic_0001>

<bundles_post_ra>
// kernel: tpu_custom_call.1
= control target key start
LH: loop header
LB: loop body
LE: loop exit
PB: predicated region body
PF: predicated region fallthrough
CT: control target
= control target key end

     0   :  { %8 = vsyncpa [#allocation4], 0  ;;  %s400_s0 = inlined_call_operand.hbm [shape: f32[8,128], index: 0, kind: input, shape index: {}]   ;;  %s401_s1 = inlined_call_operand.hbm [shape: f32[128,128], index: 1, kind: input, shape index: {}]   ;;  %s402_s2 = inlined_call_operand.vmem [shape: f32[1,128], index: 2, kind: input, shape index: {}]   ;;  %s403_s3 = inlined_call_operand.hbm [shape: f32[8,128], index: 3, kind: output, shape index: {}]  }
   0x1   :  { %9 = vsyncpa [#allocation7], 0 }
   0x2   :  { %10 = vsyncpa [#allocation5], 0  ;;  %s326_s12 = smov [#allocation3]   ;;  %s327_s14 = smov [#allocation6]  }
   0x3   :  { %s17_s13 = sshll.u32 %s326_s12, 4  ;;  %s26_s15 = sshll.u32 %s327_s14, 4  ;;  %s18_s13 = int_to_ptr.vmem [resolvable:$true] %s17_s13  ;;  %s354_s15 = int_to_ptr.vmem [resolvable:$true] %s26_s15 }
   0x4   :  { %s254_s18 = scalar_lea.hbm %s400_s0, 128 }
   0x5   :  { %p255_p0 = scmp.ne.s32.totalorder %s400_s0, %s254_s18  ;;  %p258_p1 = scmp.lt.u32.totalorder %s254_s18, %s400_s0 }
   0x7   :  { %p260_p2 = pnand %p258_p1, %p255_p0 }
   0x9   :  { %263 = shalt.err (!%p260_p2)
}
   0xa   :  { %s264_s23 = scalar_lea.vmem %s18_s13, 128  ;;  %p269_p4 = scmp.lt.s32.totalorder %s18_s13, %s18_s13 }
   0xb   :  { %p265_p3 = scmp.ne.s32.totalorder %s18_s13, %s264_s23  ;;  %p270_p5 = scmp.lt.s32.totalorder %s264_s23, %s264_s23 }
   0xd   :  { %p271_p6 = por %p270_p5, %p269_p4 }
   0xf   :  { %p272_p7 = pnand %p271_p6, %p265_p3 }
  0x11   :  { %275 = shalt.err (!%p272_p7)
}
  0x12   :  { %20 = dma.hbm_to_vmem [thread:$0]  %s400_s0, 128, %s18_s13, [#allocation4]  }
  0x13   :  { %s276_s28 = scalar_lea.hbm %s401_s1, 2048 }
  0x14   :  { %p277_p8 = scmp.ne.s32.totalorder %s401_s1, %s276_s28  ;;  %p280_p9 = scmp.lt.u32.totalorder %s276_s28, %s401_s1 }
  0x16   :  { %p282_p10 = pnand %p280_p9, %p277_p8 }
  0x18   :  { %285 = shalt.err (!%p282_p10)
}
  0x19   :  { %s286_s6 = scalar_lea.vmem %s354_s15, 2048  ;;  %p291_p12 = scmp.lt.s32.totalorder %s354_s15, %s354_s15 }
  0x1a   :  { %p287_p11 = scmp.ne.s32.totalorder %s354_s15, %s286_s6  ;;  %p292_p13 = scmp.lt.s32.totalorder %s286_s6, %s286_s6 }
  0x1c   :  { %p293_p0 = por %p292_p13, %p291_p12 }
  0x1e   :  { %p294_p1 = pnand %p293_p0, %p287_p11 }
  0x20   :  { %297 = shalt.err (!%p294_p1)
}
  0x21   :  { %s328_s0 = smov 128   ;;  %s329_s7 = smov 8  }
  0x22   :  { %32 = dma.hbm_to_vmem [thread:$0]  %s401_s1, 2048, %s354_s15, [#allocation7], %s328_s0, %s328_s0, %s329_s7  }
  0x23   :  { %320 = dma.done.wait [#allocation4], 128  }
  0x24   :  { %321 = vsyncadd [#allocation4], 4294967168 }
  0x25   :  { %322 = dma.done.wait [#allocation7], 2048  }
  0x26   :  { %323 = vsyncadd [#allocation7], 4294965248  ;;  %v330_v0 = vmov 0.0|0.0   ;;  %vm331_vm0 = vmmov 0   ;;  %v332_v1 = vmov 0.0   ;;  %v42_v2 = vld [vmem:[#allocation6] sm:$0xff] }
  0x27   :  { %222 = vmatprep.subr.bf16.mxu0 %v330_v0  ;;  %219 = vmatprep.mubr.msk.f32.mxu0 %vm331_vm0, %v332_v1  ;;  %v43_v3 = vld [vmem:[#allocation6 + $0x8] sm:$0xff]  ;;  %v44_v4 = vld [vmem:[#allocation6 + $0x10] sm:$0xff]  ;;  %v45_v6 = vld [vmem:[#allocation6 + $0x18] sm:$0xff]  ;;  %s333_s11 = smov [#allocation8]  }
  0x28   :  { %v223_v5 = vpack.c.bf16 %v43_v3, %v42_v2  ;;  %v226_v7 = vpack.c.bf16 %v45_v6, %v44_v4  ;;  %v46_v8 = vld [vmem:[#allocation6 + $0x20] sm:$0xff]  ;;  %v47_v9 = vld [vmem:[#allocation6 + $0x28] sm:$0xff]  ;;  %v48_v11 = vld [vmem:[#allocation6 + $0x30] sm:$0xff]  ;;  %s159_s12 = sshll.u32 %s333_s11, 4  ;;  %s160_s12 = int_to_ptr.vmem [resolvable:$true] %s159_s12 }
  0x29   :  { %v229_v10 = vpack.c.bf16 %v47_v9, %v46_v8  ;;  %v49_v12 = vld [vmem:[#allocation6 + $0x38] sm:$0xff]  ;;  %v50_v14 = vld [vmem:[#allocation6 + $0x40] sm:$0xff]  ;;  %v51_v15 = vld [vmem:[#allocation6 + $0x48] sm:$0xff]  ;;  %s298_s13 = scalar_lea.vmem %s160_s12, 128  ;;  %p303_p3 = scmp.lt.s32.totalorder %s160_s12, %s160_s12 }
  0x2a   :  { %224 = vmatpush3.bf16.msra.mxu0 %v223_v5  ;;  %v232_v13 = vpack.c.bf16 %v49_v12, %v48_v11  ;;  %v235_v16 = vpack.c.bf16 %v51_v15, %v50_v14  ;;  %v52_v17 = vld [vmem:[#allocation6 + $0x50] sm:$0xff]  ;;  %v53_v18 = vld [vmem:[#allocation6 + $0x58] sm:$0xff]  ;;  %v54_v20 = vld [vmem:[#allocation6 + $0x60] sm:$0xff]  ;;  %p299_p2 = scmp.ne.s32.totalorder %s160_s12, %s298_s13  ;;  %p304_p4 = scmp.lt.s32.totalorder %s298_s13, %s298_s13 }
  0x2b   :  { %225 = vmatprep.subr.bf16.mxu0 %v330_v0  ;;  %v238_v19 = vpack.c.bf16 %v53_v18, %v52_v17  ;;  %v55_v21 = vld [vmem:[#allocation6 + $0x68] sm:$0xff]  ;;  %v56_v23 = vld [vmem:[#allocation6 + $0x70] sm:$0xff]  ;;  %v57_v24 = vld [vmem:[#allocation6 + $0x78] sm:$0xff] }
  0x2c   :  { %v241_v22 = vpack.c.bf16 %v55_v21, %v54_v20  ;;  %v244_v25 = vpack.c.bf16 %v57_v24, %v56_v23  ;;  %v41_v26 = vld [vmem:[#allocation3] sm:$0xff]  ;;  %p305_p5 = por %p304_p4, %p303_p3 }
  0x2d   :  { %v169_v27 = vld [vmem:[%s402_s2] ss:$0 sm:$0xff] }
  0x2e   :  { %227 = vmatpush3.bf16.msra.mxu0 %v226_v7  ;;  %p306_p6 = pnand %p305_p5, %p299_p2 }
  0x2f   :  { %228 = vmatprep.subr.bf16.mxu0 %v330_v0 }
  0x32   :  { %230 = vmatpush3.bf16.msra.mxu0 %v229_v10 }
  0x33   :  { %231 = vmatprep.subr.bf16.mxu0 %v330_v0 }
  0x36   :  { %233 = vmatpush3.bf16.msra.mxu0 %v232_v13 }
  0x37   :  { %234 = vmatprep.subr.bf16.mxu0 %v330_v0 }
  0x3a   :  { %236 = vmatpush3.bf16.msra.mxu0 %v235_v16 }
  0x3b   :  { %237 = vmatprep.subr.bf16.mxu0 %v330_v0 }
  0x3e   :  { %239 = vmatpush3.bf16.msra.mxu0 %v238_v19 }
  0x3f   :  { %240 = vmatprep.subr.bf16.mxu0 %v330_v0 }
  0x42   :  { %242 = vmatpush3.bf16.msra.mxu0 %v241_v22 }
  0x43   :  { %243 = vmatprep.subr.bf16.mxu0 %v330_v0 }
  0x46   :  { %245 = vmatpush3.bf16.msra.mxu0 %v244_v25 }
  0x49   :  { %220 = vmatmul.mubr.f32.vlgmr.msra.gmra.mrb[0].mxu0 %v41_v26 }
 0x11c   :  { %v124_v28 = vpop.f32.mrb[0].mxu0 }
 0x11d   :  { %v151_v29 = vadd.f32 %v169_v27, %v124_v28  ;;  %v221_v30 = vpop.f32.mrb[1].mxu0 }
 0x11f   :  { %152 = vst [vmem:[#allocation8] sm:$0xff] %v151_v29 }
 0x120   :  { %309 = shalt.err (!%p306_p6)
}
 0x121   :  { %s310_s16 = scalar_lea.hbm %s403_s3, 128 }
 0x122   :  { %p311_p7 = scmp.ne.s32.totalorder %s403_s3, %s310_s16  ;;  %p314_p8 = scmp.lt.u32.totalorder %s310_s16, %s403_s3 }
 0x124   :  { %p316_p9 = pnand %p314_p8, %p311_p7 }
 0x126   :  { %319 = shalt.err (!%p316_p9)
}
 0x127   :  { %162 = dma.vmem_to_hbm [thread:$0]  %s160_s12, 128, %s403_s3, [#allocation5]  }
 0x128   :  { %324 = dma.done.wait [#allocation5], 128  }
 0x129   :  { %325 = vsyncadd [#allocation5], 4294967168 }
 0x12a   :  { %166 = vsyncpa [#allocation4], 1 }
 0x12b   :  { %167 = vsyncpa [#allocation7], 1 }
 0x12c   :  { %168 = vsyncpa [#allocation5], 1 }

</bundles_post_ra>
